<compile_context>
chip_gen: v7x
topology: tpu7x:2x2x1
jax: 0.10.0
libtpu: 0.0.40
codegen_flags: <defaults>
</compile_context>

<pallas_src>
import functools
import math

import jax
import jax.numpy as jnp
from jax.experimental import pallas as pl
from jax.experimental.pallas import tpu as pltpu


# ---------------------------------------------------------------------------
# Generation-aware budgets
# ---------------------------------------------------------------------------
def _vmem_capacity_bytes():
    try:
        return int(pltpu.get_tpu_info().vmem_capacity_bytes)
    except Exception:
        return 64 * 1024 * 1024          # conservative (v7x-sized) fallback


_VMEM_CAP = _vmem_capacity_bytes()
if _VMEM_CAP > 96 * 1024 * 1024:         # v5e / v6e: 128 MiB VMEM per core
    _VMEM_LIMIT = 96 * 1024 * 1024
    _BLOCK_BUDGET = 8 * 1024 * 1024      # normalize pass ~4x (in+out, 2-buffered)
else:                                    # v7x: 64 MiB VMEM per TensorCore
    _VMEM_LIMIT = 48 * 1024 * 1024
    _BLOCK_BUDGET = 4 * 1024 * 1024


# ---------------------------------------------------------------------------
# Tile / packing helpers (all static Python ints)
# ---------------------------------------------------------------------------
def _channel_group(m, c):
    """Pack g channel groups per row so the lane dim reaches ~128 (small C)."""
    if c >= 128:
        return 1
    g = max(1, 128 // c)
    while g > 1 and m % g != 0:
        g -= 1
    return g


def _row_tile(m, c, itemsize):
    """Row tile for a (rows, lanes) layout: budget-sized, dtype-native sublane tiling."""
    sub = max(8, 32 // itemsize)                       # 8 (f32) / 16 (bf16) / 32 (i8)
    budget_rows = max(sub, _BLOCK_BUDGET // (itemsize * c))
    budget_rows = max(sub, (budget_rows // sub) * sub)
    if m <= sub:
        return m                                        # full-dim block (legal), tiny input
    tm = min(m, budget_rows)
    return max(sub, (tm // sub) * sub)


def _row_len_tiles(r, length, itemsize):
    """(rows, L) tiles for the flattened (N*C, L) layout: prefer full, contiguous L."""
    sub = max(8, 32 // itemsize)
    if sub * length * itemsize <= _BLOCK_BUDGET:
        tl = length                                     # full-L blocks: contiguous DMA
        tr = _row_tile(r, max(length, 1), itemsize)
    else:
        tr = r if r < sub else sub
        tl = max(128, (_BLOCK_BUDGET // (tr * itemsize) // 128) * 128)
        tl = min(tl, length)
    return tr, tl


# ---------------------------------------------------------------------------
# Kernels
# ---------------------------------------------------------------------------
def _bn2d_stats_kernel(x_ref, shift_ref, sum_ref, ss_ref, s8, ss8, *,
                       m_total, tm, nsub, nblocks, half):
    """Per-channel sum / sum-of-squares of (x - shift), C on the lane axis.

    VPU-only accumulation into an (nsub, C) scratch; the single cross-sublane
    reduce happens once, at the last grid step of each core's range.
    """
    p = pl.program_id(0)                 # TensorCore split ("parallel")
    i = pl.program_id(1)                 # row-block step ("arbitrary")
    g = p * half + i                     # global row-block index (may be a pad step)
    last_real = nblocks - 1
    c = x_ref.shape[-1]

    @pl.when(i == 0)
    def _():
        s8[...] = jnp.zeros_like(s8)
        ss8[...] = jnp.zeros_like(ss8)

    def accum(xv):
        xr = xv.reshape(-1, nsub, c)     # sublane-group partial sums (VPU adds)
        s8[...] += xr.sum(0)
        ss8[...] += (xr * xr).sum(0)

    @pl.when(g < last_real)              # full interior tiles: no masking at all
    def _():
        accum(x_ref[...].astype(jnp.float32) - shift_ref[...])

    @pl.when(g == last_real)             # globally-last (possibly ragged) tile
    def _():
        x = x_ref[...].astype(jnp.float32) - shift_ref[...]
        if m_total % tm != 0:
            row = jax.lax.broadcasted_iota(jnp.int32, (tm, 1), 0)
            x = jnp.where(row < (m_total % tm), x, 0.0)
        accum(x)

    @pl.when(i == pl.num_programs(1) - 1)    # one cross-sublane reduce per core
    def _():
        sum_ref[0] = s8[...].sum(0, keepdims=True)
        ss_ref[0] = ss8[...].sum(0, keepdims=True)


def _rows_stats_kernel(x_ref, shift_ref, s_ref, ss_ref, *, l_total, tl):
    """Per-row sum / sum-of-squares of (x - shift) for the flattened (N*C, L) view."""
    li = pl.program_id(1)

    @pl.when(li == 0)
    def _():
        s_ref[...] = jnp.zeros_like(s_ref)
        ss_ref[...] = jnp.zeros_like(ss_ref)

    def accum(xv):
        ones = jnp.ones((xv.shape[1], 1), jnp.float32)
        # Lane reduction on the otherwise idle MXU (x streams as LHS, ones is tiny).
        s_ref[...] += jnp.dot(xv, ones, preferred_element_type=jnp.float32)
        ss_ref[...] += jnp.dot(xv * xv, ones, preferred_element_type=jnp.float32)

    x = x_ref[...].astype(jnp.float32) - shift_ref[...]
    if l_total % tl != 0:
        last = pl.num_programs(1) - 1

        @pl.when(li != last)             # full interior L tiles: unmasked
        def _():
            accum(x)

        @pl.when(li == last)             # ragged last L tile
        def _():
            col = jax.lax.broadcasted_iota(jnp.int32, x.shape, 1)
            accum(jnp.where(col < (l_total % tl), x, 0.0))
    else:
        accum(x)


def _affine_kernel(x_ref, scale_ref, bias_ref, y_ref):
    """y = x * scale + bias; scale/bias broadcast from (1, C) or (rows, 1)."""
    x = x_ref[...].astype(jnp.float32)
    y_ref[...] = (x * scale_ref[...] + bias_ref[...]).astype(y_ref.dtype)


# ---------------------------------------------------------------------------
# pallas_call wrappers
# ---------------------------------------------------------------------------
def _stats_2d(xp, shift_row, tm):
    m, c = xp.shape
    nblocks = pl.cdiv(m, tm)
    ncore = 2 if nblocks >= 2 else 1     # leading "parallel" axis -> v7x TC split
    half = pl.cdiv(nblocks, ncore)
    nsub = math.gcd(tm, 8)

    kern = functools.partial(_bn2d_stats_kernel, m_total=m, tm=tm, nsub=nsub,
                             nblocks=nblocks, half=half)

    def x_map(p, i):
        return (jnp.minimum(p * half + i, nblocks - 1), 0)   # clamp pad steps

    s, ss = pl.pallas_call(
        kern,
        grid=(ncore, half),
        in_specs=[pl.BlockSpec((tm, c), x_map),
                  pl.BlockSpec((1, c), lambda p, i: (0, 0))],
        out_specs=(pl.BlockSpec((1, 1, c), lambda p, i: (p, 0, 0)),
                   pl.BlockSpec((1, 1, c), lambda p, i: (p, 0, 0))),
        out_shape=(jax.ShapeDtypeStruct((ncore, 1, c), jnp.float32),
                   jax.ShapeDtypeStruct((ncore, 1, c), jnp.float32)),
        scratch_shapes=[pltpu.VMEM((nsub, c), jnp.float32),
                        pltpu.VMEM((nsub, c), jnp.float32)],
        compiler_params=pltpu.CompilerParams(
            dimension_semantics=("parallel", "arbitrary"),
            vmem_limit_bytes=_VMEM_LIMIT),
    )(xp, shift_row)
    return s.reshape(ncore, c).sum(0), ss.reshape(ncore, c).sum(0)


def _normalize_2d(xp, scale_row, bias_row, tm):
    m, c = xp.shape
    return pl.pallas_call(
        _affine_kernel,
        grid=(pl.cdiv(m, tm),),
        in_specs=[pl.BlockSpec((tm, c), lambda i: (i, 0)),
                  pl.BlockSpec((1, c), lambda i: (0, 0)),
                  pl.BlockSpec((1, c), lambda i: (0, 0))],
        out_specs=pl.BlockSpec((tm, c), lambda i: (i, 0)),
        out_shape=jax.ShapeDtypeStruct((m, c), xp.dtype),
        compiler_params=pltpu.CompilerParams(
            dimension_semantics=("parallel",),
            vmem_limit_bytes=_VMEM_LIMIT),
    )(xp, scale_row, bias_row)


def _stats_rows(xr, shift_col, tr, tl):
    r, length = xr.shape
    kern = functools.partial(_rows_stats_kernel, l_total=length, tl=tl)
    s, ss = pl.pallas_call(
        kern,
        grid=(pl.cdiv(r, tr), pl.cdiv(length, tl)),
        in_specs=[pl.BlockSpec((tr, tl), lambda ri, li: (ri, li)),
                  pl.BlockSpec((tr, 1), lambda ri, li: (ri, 0))],
        out_specs=(pl.BlockSpec((tr, 1), lambda ri, li: (ri, 0)),
                   pl.BlockSpec((tr, 1), lambda ri, li: (ri, 0))),
        out_shape=(jax.ShapeDtypeStruct((r, 1), jnp.float32),
                   jax.ShapeDtypeStruct((r, 1), jnp.float32)),
        compiler_params=pltpu.CompilerParams(
            dimension_semantics=("parallel", "arbitrary"),
            vmem_limit_bytes=_VMEM_LIMIT),
    )(xr, shift_col)
    return s, ss


def _normalize_rows(xr, scale_col, bias_col, tr, tl):
    r, length = xr.shape
    return pl.pallas_call(
        _affine_kernel,
        grid=(pl.cdiv(r, tr), pl.cdiv(length, tl)),
        in_specs=[pl.BlockSpec((tr, tl), lambda ri, li: (ri, li)),
                  pl.BlockSpec((tr, 1), lambda ri, li: (ri, 0)),
                  pl.BlockSpec((tr, 1), lambda ri, li: (ri, 0))],
        out_specs=pl.BlockSpec((tr, tl), lambda ri, li: (ri, li)),
        out_shape=jax.ShapeDtypeStruct((r, length), xr.dtype),
        compiler_params=pltpu.CompilerParams(
            dimension_semantics=("parallel", "parallel"),
            vmem_limit_bytes=_VMEM_LIMIT),
    )(xr, scale_col, bias_col)


# ---------------------------------------------------------------------------
# Module-equivalent wrapper
# ---------------------------------------------------------------------------
class BatchNorm1d:
    """JAX/Pallas port of the reference PyTorch BatchNorm1d module."""

    def __init__(self, num_features, eps=1e-5, momentum=0.1):
        self.num_features = num_features
        self.eps = eps
        self.momentum = momentum
        self.training = True
        self.gamma = jnp.ones((num_features,), jnp.float32)
        self.beta = jnp.zeros((num_features,), jnp.float32)
        self.running_mean = jnp.zeros((num_features,), jnp.float32)
        self.running_var = jnp.ones((num_features,), jnp.float32)

    # -- tiny (C,)-sized glue, plain JAX ------------------------------------
    def _scale_bias(self, mean, var):
        scale = self.gamma * jax.lax.rsqrt(var.astype(jnp.float32) + self.eps)
        bias = self.beta - mean.astype(jnp.float32) * scale
        return scale.astype(jnp.float32), bias.astype(jnp.float32)

    def _update_running(self, mean, var):
        if self.momentum is None:
            # TODO(synk): cumulative moving average (momentum=None) not implemented.
            raise NotImplementedError
        m = self.momentum
        # Biased variance EMA (correction=0), exactly like the reference forward().
        self.running_mean = (1 - m) * self.running_mean + m * mean
        self.running_var = (1 - m) * self.running_var + m * var

    # -- forward -------------------------------------------------------------
    def __call__(self, x):
        if x.ndim == 3:
            return self._forward_3d(x)
        if x.ndim == 2:
            return self._forward_2d(x)
        raise ValueError("BatchNorm1d expects 2D or 3D input")

    def _forward_2d(self, x):
        m, c = x.shape
        assert c == self.num_features
        g = _channel_group(m, c)                       # lane-density packing for small C
        xp = x.reshape(m // g, g * c) if g > 1 else x  # free row-major reshape
        itemsize = x.dtype.itemsize
        tm = _row_tile(xp.shape[0], xp.shape[1], itemsize)

        if self.training:
            # Cheap per-channel shift (numerics: avoids E[x^2]-E[x]^2 cancellation).
            shift_c = jnp.mean(x[: min(8, m)].astype(jnp.float32), axis=0)
            shift = jnp.tile(shift_c, g) if g > 1 else shift_c
            s, ss = _stats_2d(xp, shift.reshape(1, -1), tm)      # (g*C,), (g*C,)
            if g > 1:
                s = s.reshape(g, c).sum(0)
                ss = ss.reshape(g, c).sum(0)
            mean = shift_c + s / m
            var = jnp.maximum(ss / m - (s / m) ** 2, 0.0)        # biased (correction=0)
            self._update_running(mean, var)
        else:
            mean, var = self.running_mean, self.running_var

        scale, bias = self._scale_bias(mean, var)
        if g > 1:
            scale = jnp.tile(scale, g)
            bias = jnp.tile(bias, g)
        y = _normalize_2d(xp, scale.reshape(1, -1), bias.reshape(1, -1), tm)
        return y.reshape(m, c) if g > 1 else y

    def _forward_3d(self, x):
        n, c, length = x.shape
        assert c == self.num_features
        r = n * c
        xr = x.reshape(r, length)                      # free row-major view; L on lanes
        itemsize = x.dtype.itemsize
        tr, tl = _row_len_tiles(r, length, itemsize)

        if self.training:
            k = min(128, length)
            shift_c = jnp.mean(x[0, :, :k].astype(jnp.float32), axis=-1)   # (C,)
            shift_col = jnp.tile(shift_c, n).reshape(r, 1)
            s_rows, ss_rows = _stats_rows(xr, shift_col, tr, tl)           # (R,1) each
            cnt = n * length
            s_c = s_rows.reshape(n, c).sum(0)
            ss_c = ss_rows.reshape(n, c).sum(0)
            mean = shift_c + s_c / cnt
            var = jnp.maximum(ss_c / cnt - (s_c / cnt) ** 2, 0.0)          # biased
            self._update_running(mean, var)
        else:
            mean, var = self.running_mean, self.running_var

        scale, bias = self._scale_bias(mean, var)                          # (C,)
        scale_col = jnp.tile(scale, n).reshape(r, 1)
        bias_col = jnp.tile(bias, n).reshape(r, 1)
        y = _normalize_rows(xr, scale_col, bias_col, tr, tl)
        return y.reshape(n, c, length)


# ---------------------------------------------------------------------------
# Pure-JAX reference (mirrors the PyTorch forward) for verification
# ---------------------------------------------------------------------------
def _ref_forward(x, gamma, beta, eps):
    if x.ndim == 3:
        x_t = jnp.transpose(x, (0, 2, 1))
        dims = (0, 1)
    else:
        x_t = x
        dims = (0,)
    xmean = x_t.mean(dims)
    xvar = x_t.var(dims)  # biased (correction=0)
    y_t = gamma * (x_t - xmean) / jnp.sqrt(xvar + eps) + beta
    if x.ndim == 3:
        return jnp.transpose(y_t, (0, 2, 1)), xmean, xvar
    return y_t, xmean, xvar


if __name__ == "__main__":
    key = jax.random.PRNGKey(0)
    k1, k2, k3 = jax.random.split(key, 3)

    # 3-D input (N, C, L): handled via the free (N*C, L) row view
    x3 = jax.random.normal(k1, (2, 4, 16), dtype=jnp.float32) + 3.0
    bn3 = BatchNorm1d(num_features=4)
    y3 = jax.block_until_ready(bn3(x3))
    y3_ref, m_ref, v_ref = _ref_forward(x3, bn3.gamma, bn3.beta, bn3.eps)
    assert y3.shape == x3.shape
    assert jnp.allclose(y3, y3_ref, atol=1e-5, rtol=1e-5)
    assert jnp.allclose(bn3.running_mean, 0.1 * m_ref, atol=1e-5)
    assert jnp.allclose(bn3.running_var, 0.9 + 0.1 * v_ref, atol=1e-5)

    # 2-D input (N, C) with small C -> channel-group packing (4 groups per 128 lanes)
    x2 = jax.random.normal(k2, (8, 32), dtype=jnp.float32)
    bn2 = BatchNorm1d(num_features=32)
    y2 = jax.block_until_ready(bn2(x2))
    y2_ref, _, _ = _ref_forward(x2, bn2.gamma, bn2.beta, bn2.eps)
    assert y2.shape == x2.shape
    assert jnp.allclose(y2, y2_ref, atol=1e-5, rtol=1e-5)

    # 2-D input exercising two row blocks (dual-core stats split) + ragged last tile
    xl = jax.random.normal(k3, (1100, 256), dtype=jnp.float32) * 2.0 + 5.0
    bnl = BatchNorm1d(num_features=256)
    yl = jax.block_until_ready(bnl(xl))
    yl_ref, _, _ = _ref_forward(xl, bnl.gamma, bnl.beta, bnl.eps)
    assert jnp.allclose(yl, yl_ref, atol=1e-4, rtol=1e-4)

    # eval mode uses the (now updated) running statistics
    bn3.training = False
    y3_eval = jax.block_until_ready(bn3(x3))
    y3_eval_ref = (bn3.gamma[None, :, None]
                   * (x3 - bn3.running_mean[None, :, None])
                   / jnp.sqrt(bn3.running_var[None, :, None] + bn3.eps)
                   + bn3.beta[None, :, None])
    assert jnp.allclose(y3_eval, y3_eval_ref, atol=1e-5, rtol=1e-5)

    print("KERNEL_OK")
</pallas_src>

<mosaic_0001>
module attributes {stable_mosaic.version = 11 : i64} {
  func.func @_rows_stats_kernel(%arg0: i32, %arg1: i32, %arg2: memref<8x16xf32, #tpu.memory_space<vmem>>, %arg3: memref<8x1xf32, #tpu.memory_space<vmem>>, %arg4: memref<8x1xf32, #tpu.memory_space<vmem>>, %arg5: memref<8x1xf32, #tpu.memory_space<vmem>>) attributes {dimension_semantics = [#tpu.dimension_semantics<parallel>, #tpu.dimension_semantics<arbitrary>], iteration_bounds = array<i64: 1, 1>, scalar_prefetch = 0 : i64, scratch_operands = 0 : i64, tpu.core_type = #tpu.core_type<tc>, window_params = [{transform_indices = @transform_0, window_bounds = array<i64: 8, 16>}, {transform_indices = @transform_1, window_bounds = array<i64: 8, 1>}, {transform_indices = @transform_2, window_bounds = array<i64: 8, 1>}, {transform_indices = @transform_3, window_bounds = array<i64: 8, 1>}]} {
    %c0_i32 = arith.constant 0 : i32
    %0 = arith.cmpi eq, %arg1, %c0_i32 : i32
    %1 = arith.extui %0 : i1 to i32
    %c0_i32_0 = arith.constant 0 : i32
    %2 = arith.cmpi ne, %1, %c0_i32_0 : i32
    scf.if %2 {
      %cst_14 = arith.constant 0.000000e+00 : f32
      %17 = vector.broadcast %cst_14 : f32 to vector<8x1xf32>
      %c0_15 = arith.constant 0 : index
      %c0_16 = arith.constant 0 : index
      %18 = vector.load %arg4[%c0_15, %c0_16] : memref<8x1xf32, #tpu.memory_space<vmem>>, vector<8x1xf32>
      tpu.vector_store %arg4[%c0_15, %c0_16], %17 {strides = array<i32>} : memref<8x1xf32, #tpu.memory_space<vmem>>, vector<8x1xf32>,
      %cst_17 = arith.constant 0.000000e+00 : f32
      %19 = vector.broadcast %cst_17 : f32 to vector<8x1xf32>
      %c0_18 = arith.constant 0 : index
      %c0_19 = arith.constant 0 : index
      %20 = vector.load %arg5[%c0_18, %c0_19] : memref<8x1xf32, #tpu.memory_space<vmem>>, vector<8x1xf32>
      tpu.vector_store %arg5[%c0_18, %c0_19], %19 {strides = array<i32>} : memref<8x1xf32, #tpu.memory_space<vmem>>, vector<8x1xf32>,
    } else {
    }
    %c0 = arith.constant 0 : index
    %c0_1 = arith.constant 0 : index
    %3 = vector.load %arg2[%c0, %c0_1] : memref<8x16xf32, #tpu.memory_space<vmem>>, vector<8x16xf32>
    %c0_2 = arith.constant 0 : index
    %c0_3 = arith.constant 0 : index
    %4 = vector.load %arg3[%c0_2, %c0_3] : memref<8x1xf32, #tpu.memory_space<vmem>>, vector<8x1xf32>
    %5 = vector.broadcast %4 : vector<8x1xf32> to vector<8x16xf32>
    %6 = arith.subf %3, %5 : vector<8x16xf32>
    %cst = arith.constant 1.000000e+00 : f32
    %7 = vector.broadcast %cst : f32 to vector<16x1xf32>
    %c0_4 = arith.constant 0 : index
    %c0_5 = arith.constant 0 : index
    %8 = vector.load %arg4[%c0_4, %c0_5] : memref<8x1xf32, #tpu.memory_space<vmem>>, vector<8x1xf32>
    %cst_6 = arith.constant dense<0.000000e+00> : vector<8x1xf32>
    %9 = tpu.matmul %6, %7, %cst_6 {dimension_numbers = #tpu.dot_dimension_numbers<[1], [0], [0], [1], [0, 0, 1, 1], [], []>} : vector<8x16xf32>, vector<16x1xf32>, vector<8x1xf32> -> vector<8x1xf32>
    %10 = arith.addf %8, %9 : vector<8x1xf32>
    %c0_7 = arith.constant 0 : index
    %c0_8 = arith.constant 0 : index
    %11 = vector.load %arg4[%c0_7, %c0_8] : memref<8x1xf32, #tpu.memory_space<vmem>>, vector<8x1xf32>
    tpu.vector_store %arg4[%c0_7, %c0_8], %10 {strides = array<i32>} : memref<8x1xf32, #tpu.memory_space<vmem>>, vector<8x1xf32>,
    %c0_9 = arith.constant 0 : index
    %c0_10 = arith.constant 0 : index
    %12 = vector.load %arg5[%c0_9, %c0_10] : memref<8x1xf32, #tpu.memory_space<vmem>>, vector<8x1xf32>
    %13 = arith.mulf %6, %6 : vector<8x16xf32>
    %cst_11 = arith.constant dense<0.000000e+00> : vector<8x1xf32>
    %14 = tpu.matmul %13, %7, %cst_11 {dimension_numbers = #tpu.dot_dimension_numbers<[1], [0], [0], [1], [0, 0, 1, 1], [], []>} : vector<8x16xf32>, vector<16x1xf32>, vector<8x1xf32> -> vector<8x1xf32>
    %15 = arith.addf %12, %14 : vector<8x1xf32>
    %c0_12 = arith.constant 0 : index
    %c0_13 = arith.constant 0 : index
    %16 = vector.load %arg5[%c0_12, %c0_13] : memref<8x1xf32, #tpu.memory_space<vmem>>, vector<8x1xf32>
    tpu.vector_store %arg5[%c0_12, %c0_13], %15 {strides = array<i32>} : memref<8x1xf32, #tpu.memory_space<vmem>>, vector<8x1xf32>,
    return
  }
  func.func @transform_0(%arg0: i32, %arg1: i32) -> (i32, i32) {
    %c0_i32 = arith.constant 0 : i32
    return %arg0, %arg1 : i32, i32
  }
  func.func @transform_1(%arg0: i32, %arg1: i32) -> (i32, i32) {
    %c0_i32 = arith.constant 0 : i32
    %c0_i32_0 = arith.constant 0 : i32
    return %arg0, %c0_i32 : i32, i32
  }
  func.func @transform_2(%arg0: i32, %arg1: i32) -> (i32, i32) {
    %c0_i32 = arith.constant 0 : i32
    %c0_i32_0 = arith.constant 0 : i32
    return %arg0, %c0_i32 : i32, i32
  }
  func.func @transform_3(%arg0: i32, %arg1: i32) -> (i32, i32) {
    %c0_i32 = arith.constant 0 : i32
    %c0_i32_0 = arith.constant 0 : i32
    return %arg0, %c0_i32 : i32, i32
  }
}

</mosaic_0001>

<bundles_post_ra>
// kernel: tpu_custom_call.1
= control target key start
LH: loop header
LB: loop body
LE: loop exit
PB: predicated region body
PF: predicated region fallthrough
CT: control target
= control target key end

     0   :  { %v223_v0 = vmov 0   ;;  %v224_v2 = vmov 0.0|0.0   ;;  %v225_v3 = vmov 1.0|1.0   ;;  %vm226_vm0 = vmmov 0   ;;  %s276_s1 = inlined_call_operand.vmem [shape: f32[8,1], index: 1, kind: input, shape index: {}]   ;;  %s277_s2 = inlined_call_operand.vmem [shape: f32[8,1], index: 2, kind: output, shape index: {0}]   ;;  %s278_s0 = inlined_call_operand.vmem [shape: f32[8,16], index: 0, kind: input, shape index: {}]   ;;  %s279_s3 = inlined_call_operand.vmem [shape: f32[8,1], index: 3, kind: output, shape index: {1}]  }
   0x1   :  { %222 = vset.pattern.permute.xlu0 %v223_v0  ;;  %v21_v1 = vld [vmem:[%s276_s1] sm:$0xff]  ;;  %213 = vmatprep.subr.bf16.mxu0 %v224_v2  ;;  %v227_v4 = vmov 0.0   ;;  %vm17_vm1 = vcmask 7168   ;;  %vm29_vm2 = vcmask 130048  }
   0x2   :  { %24 = vperm.xlu0 %222, %v21_v1   ;;  %214 = vmatpush3.bf16.msra.mxu0 %v225_v3  ;;  %18 = vst.msk [vmem:[%s277_s2] sm:$0xff] %vm17_vm1, %v227_v4  ;;  %v20_v5 = vld [vmem:[%s278_s0] sm:$0xff]  ;;  %19 = vst.msk [vmem:[%s279_s3] sm:$0xff] %vm17_vm1, %v227_v4 }
   0x3   :  { %215 = vmatprep.subr.bf16.mxu1 %v224_v2  ;;  %203 = vmatprep.mubr.msk.f32.mxu0 %vm226_vm0, %v227_v4 }
   0x4   :  { %216 = vmatpush3.bf16.msra.mxu1 %v225_v3  ;;  %210 = vmatprep.mubr.msk.f32.mxu1 %vm226_vm0, %v227_v4 }
   0x9   :  { %v28_v9 = vld [vmem:[%s277_s2] sm:$0xff] }
   0xa   :  { %v106_v11 = vld [vmem:[%s279_s3] sm:$0xff] }
  0x81   :  { %v25_v6 = vpop.permute.xlu0 %24 }
  0x82   :  { %v27_v7 = vsub.f32 %v20_v5, %v25_v6 }
  0x84   :  { %v107_v8 = vmul.f32 %v27_v7, %v27_v7  ;;  %204 = vmatmul.mubr.msk.f32.vlgmr.msra.gmra.mrb[0].mxu0 %vm29_vm2, %v27_v7 }
  0x86   :  { %211 = vmatmul.mubr.msk.f32.vlgmr.msra.gmra.mrb[0].mxu1 %vm29_vm2, %v107_v8 }
 0x157   :  { %v99_v10 = vpop.f32.mrb[0].mxu0 }
 0x158   :  { %v103_v12 = vadd.f32 %v99_v10, %v28_v9  ;;  %v205_v13 = vpop.f32.mrb[1].mxu0 }
 0x159   :  { %v177_v14 = vpop.f32.mrb[0].mxu1 }
 0x15a   :  { %105 = vst.msk [vmem:[%s277_s2] sm:$0xff] %vm17_vm1, %v103_v12  ;;  %v181_v15 = vadd.f32 %v177_v14, %v106_v11  ;;  %v212_v16 = vpop.f32.mrb[1].mxu1 }
 0x15c   :  { %182 = vst.msk [vmem:[%s279_s3] sm:$0xff] %vm17_vm1, %v181_v15 }

</bundles_post_ra>
